<compile_context>
chip_gen: v5e
topology: v5e:2x2
jax: 0.10.0
libtpu: 0.0.40
codegen_flags: <defaults>
</compile_context>

<pallas_src>
import jax
import jax.numpy as jnp
from jax.experimental import pallas as pl
from jax.experimental.pallas import tpu as pltpu


def _spatial_soft_argmax_kernel(x_ref, cw_ref, o_ref):
    """One row-tile of feature maps.

    Ref shapes inside the kernel:
      x_ref : (T, HW)  f32 logits
      cw_ref: (HW, 3)  bf16 columns = [k // H, k % H, 1]  (exact small integers)
      o_ref : (T, 2)   f32 softmax-weighted means of the integer pixel indices
    """
    x = x_ref[...]                                        # (T, HW) f32
    m = jnp.max(x, axis=-1, keepdims=True)                # XLU reduce (stability)
    e = jnp.exp(x - m)                                    # EUP, f32

    # One single-pass bf16 MXU matmul (f32 accumulator) computes all three lane
    # reductions at once: s[:,0]=sum e*(k//H), s[:,1]=sum e*(k%H), s[:,2]=sum e.
    s = jnp.dot(e.astype(jnp.bfloat16), cw_ref[...],
                preferred_element_type=jnp.float32)       # (T, 3)

    d = s[:, 2:3]                                         # softmax denominator
    inv = pl.reciprocal(d, approx=True)                   # EUP approx seed ...
    inv = inv * (2.0 - d * inv)                           # ... + 1 Newton step

    # Deferred normalization: scale only the (T, 2) moments.
    o_ref[...] = s[:, 0:2] * inv


def _index_weights(h, w):
    """(H*W, 3) bf16 weights: columns [k // h, k % h, 1] for flattened pixel k.

    These are the module's meshgrid((w, h), indexing='ij') coordinates expressed
    as raw integer indices (exact in bf16 for h, w <= 257); the linspace(-1, 1)
    mapping becomes an affine on the (R, 2) output in the wrapper.
    """
    # TODO(synk): for H or W > 257 the integer indices lose bf16 exactness; split
    # the index column into coarse/fine parts if that regime ever matters.
    k = jnp.arange(h * w, dtype=jnp.int32)
    col_x = (k // h).astype(jnp.float32)       # == arange(w) repeated h times
    col_y = (k % h).astype(jnp.float32)        # == arange(h) tiled w times
    ones = jnp.ones_like(col_x)
    return jnp.stack([col_x, col_y, ones], axis=1).astype(jnp.bfloat16)


def _vmem_limit_bytes():
    """Physical-VMEM-aware scoped limit (64 MiB on v7x, 128 MiB on v5e/v6e)."""
    try:
        cap = int(pltpu.get_tpu_info().vmem_capacity_bytes)
    except Exception:                    # robust to older jax / missing attribute
        cap = 64 * 1024 * 1024           # v7x has the smallest VMEM; assume it
    return int(min((cap * 3) // 4, 96 * 1024 * 1024))


def _choose_row_tile(r, hw, vmem_limit):
    """Largest 8-multiple row tile that fits the VMEM budget, forcing >=2 tiles
    when B*C >= 16 (v7x TC split) and >=4 tiles for >2 MiB inputs (DMA overlap)."""
    if r <= 8:
        return r                                        # one tiny full-extent block
    # Per-row VMEM: double-buffered f32 input block + in-kernel intermediates
    # (exp result f32 + bf16 copy, counted conservatively as another 2x block)
    # + double-buffered lane-padded (T, 2) f32 output block.
    per_row = (2 + 2) * hw * 4 + 2 * 128 * 4
    # (HW, 3) bf16 weight block is lane-padded to 128 lanes and double-buffered.
    cw_bytes = 2 * ((hw + 15) // 16) * 16 * 128 * 2
    budget = max(vmem_limit - cw_bytes - 4 * 1024 * 1024, 8 * per_row)
    t = min(budget // per_row, 1024)
    if r * hw * 4 > 2 * 1024 * 1024:
        t = min(t, pl.cdiv(r, 4))                       # >= 4 pipelined grid steps
    if r >= 16:
        t = min(t, pl.cdiv(r, 2))                       # >= 2 tiles for v7x's 2 TCs
    t = max(8, (t // 8) * 8)                            # 8-sublane multiple
    t = min(t, max(8, (r // 8) * 8))                    # never past the 8-aligned extent
    return int(t)


def spatial_soft_argmax_pallas(x, normalize=True, row_tile=None):
    """x: (B, C, H, W) -> (B, 2*C); matches the PyTorch SpatialSoftArgmax."""
    B, C, H, W = x.shape
    R, HW = B * C, H * W

    x2 = x.reshape(R, HW).astype(jnp.float32)     # lane-dense slab, read exactly once
    cw = _index_weights(H, W)                     # (HW, 3) bf16

    vmem_limit = _vmem_limit_bytes()
    if row_tile is None:
        row_tile = _choose_row_tile(R, HW, vmem_limit)

    # No input padding copy: grid = cdiv(R, row_tile).  A ragged last block reads
    # stale VMEM for its out-of-range rows; every reduction is per-row, so the
    # garbage never contaminates valid rows, and the masked output copy never
    # writes past row R.
    grid = (pl.cdiv(R, row_tile),)

    raw = pl.pallas_call(
        _spatial_soft_argmax_kernel,
        out_shape=jax.ShapeDtypeStruct((R, 2), jnp.float32),
        grid=grid,
        in_specs=[
            pl.BlockSpec((row_tile, HW), lambda r: (r, 0)),
            pl.BlockSpec((HW, 3), lambda r: (0, 0)),   # constant index_map -> fetched once
        ],
        out_specs=pl.BlockSpec((row_tile, 2), lambda r: (r, 0)),
        compiler_params=pltpu.CompilerParams(
            # TODO(synk): switch to pltpu.CORE_PARALLEL if profiling shows the v7x
            # TensorCores are not actually splitting the "parallel" row axis.
            dimension_semantics=("parallel",),
            vmem_limit_bytes=int(vmem_limit),
        ),
    )(x2, cw)

    # Map integer-index expectations onto the module's coordinate grids:
    #   normalize=True  -> linspace(-1, 1, n): coord = idx * 2/(n-1) - 1
    #   normalize=False -> arange(n):          coord = idx
    if normalize:
        sx = 2.0 / (W - 1) if W > 1 else 0.0
        sy = 2.0 / (H - 1) if H > 1 else 0.0
        raw = raw * jnp.array([sx, sy], jnp.float32) - 1.0

    return raw.reshape(B, 2 * C)


def spatial_soft_argmax_reference(x, normalize=True):
    """Pure-JAX mirror of the PyTorch module (for verification)."""
    B, C, H, W = x.shape
    sm = jax.nn.softmax(x.reshape(B * C, H * W).astype(jnp.float32), axis=-1)
    if normalize:
        xs = jnp.linspace(-1.0, 1.0, W, dtype=jnp.float32)
        ys = jnp.linspace(-1.0, 1.0, H, dtype=jnp.float32)
    else:
        xs = jnp.arange(W, dtype=jnp.float32)
        ys = jnp.arange(H, dtype=jnp.float32)
    xc = jnp.repeat(xs, H)     # meshgrid((w,h),'ij')[0].flatten(): xs[k // H]
    yc = jnp.tile(ys, W)       # meshgrid((w,h),'ij')[1].flatten(): ys[k % H]
    x_mean = jnp.sum(sm * xc[None, :], axis=1, keepdims=True)
    y_mean = jnp.sum(sm * yc[None, :], axis=1, keepdims=True)
    return jnp.concatenate([x_mean, y_mean], axis=1).reshape(B, 2 * C)


if __name__ == "__main__":
    key = jax.random.PRNGKey(0)
    cases = [
        (2, 4, 16, 16),   # primary shape: single 8-row tile
        (5, 4, 16, 16),   # R = 20: multi-step grid with a ragged last block
        (2, 3, 8, 12),    # non-square H != W, R < 8 full-extent-block branch
    ]
    for (B, C, H, W) in cases:
        key, sub = jax.random.split(key)
        x = jax.random.normal(sub, (B, C, H, W), jnp.float32)
        for normalize in (True, False):
            out = jax.block_until_ready(
                spatial_soft_argmax_pallas(x, normalize=normalize))
            ref = spatial_soft_argmax_reference(x, normalize=normalize)
            assert out.shape == (B, 2 * C)
            # bf16 only touches the exp() weights of the fused matmul (the integer
            # coordinate columns are exact in bf16 and accumulation is f32), so
            # 2e-3 abs + 2e-3 rel comfortably covers the remaining rounding.
            if not jnp.allclose(out, ref, atol=2e-3, rtol=2e-3):
                err = float(jnp.max(jnp.abs(out - ref)))
                raise AssertionError(
                    f"Pallas kernel mismatch shape={(B, C, H, W)} "
                    f"normalize={normalize}, max abs err={err}")
    print("KERNEL_OK")
</pallas_src>

<mosaic_0001>
module attributes {stable_mosaic.version = 11 : i64} {
  func.func @_spatial_soft_argmax_kernel(%arg0: i32, %arg1: memref<8x256xf32, #tpu.memory_space<vmem>>, %arg2: memref<256x3xbf16, #tpu.memory_space<vmem>>, %arg3: memref<8x2xf32, #tpu.memory_space<vmem>>) attributes {dimension_semantics = [#tpu.dimension_semantics<parallel>], iteration_bounds = array<i64: 1>, scalar_prefetch = 0 : i64, scratch_operands = 0 : i64, tpu.core_type = #tpu.core_type<tc>, window_params = [{transform_indices = @transform_0, window_bounds = array<i64: 8, 256>}, {pipeline_mode = #tpu.pipeline_mode<synchronous>, transform_indices = @transform_1, window_bounds = array<i64: 256, 3>}, {transform_indices = @transform_2, window_bounds = array<i64: 8, 2>}]} {
    %c0 = arith.constant 0 : index
    %c0_0 = arith.constant 0 : index
    %0 = vector.load %arg1[%c0, %c0_0] : memref<8x256xf32, #tpu.memory_space<vmem>>, vector<8x256xf32>
    %cst = arith.constant dense<0xFF800000> : vector<8xf32>
    %1 = vector.multi_reduction <maximumf>, %0, %cst [1] : vector<8x256xf32> to vector<8xf32>
    %2 = vector.shape_cast %1 : vector<8xf32> to vector<8x1xf32>
    %3 = vector.broadcast %2 : vector<8x1xf32> to vector<8x256xf32>
    %4 = arith.subf %0, %3 : vector<8x256xf32>
    %5 = math.exp %4 : vector<8x256xf32>
    %6 = arith.truncf %5 : vector<8x256xf32> to vector<8x256xbf16>
    %c0_1 = arith.constant 0 : index
    %c0_2 = arith.constant 0 : index
    %7 = vector.load %arg2[%c0_1, %c0_2] : memref<256x3xbf16, #tpu.memory_space<vmem>>, vector<256x3xbf16>
    %cst_3 = arith.constant dense<0.000000e+00> : vector<8x3xf32>
    %8 = tpu.matmul %6, %7, %cst_3 {dimension_numbers = #tpu.dot_dimension_numbers<[1], [0], [0], [1], [0, 0, 1, 1], [], []>} : vector<8x256xbf16>, vector<256x3xbf16>, vector<8x3xf32> -> vector<8x3xf32>
    %9 = vector.extract_strided_slice %8 {offsets = [0, 2], sizes = [8, 1], strides = [1, 1]} : vector<8x3xf32> to vector<8x1xf32>
    %10 = tpu.reciprocal %9 {approx = true} : vector<8x1xf32> -> vector<8x1xf32>
    %11 = arith.mulf %9, %10 : vector<8x1xf32>
    %cst_4 = arith.constant 2.000000e+00 : f32
    %12 = vector.broadcast %cst_4 : f32 to vector<8x1xf32>
    %13 = arith.subf %12, %11 : vector<8x1xf32>
    %14 = arith.mulf %10, %13 : vector<8x1xf32>
    %15 = vector.extract_strided_slice %8 {offsets = [0, 0], sizes = [8, 2], strides = [1, 1]} : vector<8x3xf32> to vector<8x2xf32>
    %16 = vector.broadcast %14 : vector<8x1xf32> to vector<8x2xf32>
    %17 = arith.mulf %15, %16 : vector<8x2xf32>
    %c0_5 = arith.constant 0 : index
    %c0_6 = arith.constant 0 : index
    %18 = vector.load %arg3[%c0_5, %c0_6] : memref<8x2xf32, #tpu.memory_space<vmem>>, vector<8x2xf32>
    tpu.vector_store %arg3[%c0_5, %c0_6], %17 {strides = array<i32>} : memref<8x2xf32, #tpu.memory_space<vmem>>, vector<8x2xf32>,
    return
  }
  func.func @transform_0(%arg0: i32) -> (i32, i32) {
    %c0_i32 = arith.constant 0 : i32
    %c0_i32_0 = arith.constant 0 : i32
    return %arg0, %c0_i32 : i32, i32
  }
  func.func @transform_1(%arg0: i32) -> (i32, i32) {
    %c0_i32 = arith.constant 0 : i32
    %c0_i32_0 = arith.constant 0 : i32
    %c0_i32_1 = arith.constant 0 : i32
    return %c0_i32, %c0_i32_0 : i32, i32
  }
  func.func @transform_2(%arg0: i32) -> (i32, i32) {
    %c0_i32 = arith.constant 0 : i32
    %c0_i32_0 = arith.constant 0 : i32
    return %arg0, %c0_i32 : i32, i32
  }
}

</mosaic_0001>

<bundles_post_ra>
// kernel: tpu_custom_call.1
= control target key start
LH: loop header
LB: loop body
LE: loop exit
PB: predicated region body
PF: predicated region fallthrough
CT: control target
= control target key end

     0   :  { %v282_v28 = vmov 2   ;;  %vm188_vm0 = vcmask 15360   ;;  %s355_s0 = inlined_call_operand.vmem [shape: f32[8,256], index: 0, kind: input, shape index: {}]   ;;  %s356_s1 = inlined_call_operand.vmem [shape: bf16[256,3], index: 1, kind: input, shape index: {}]   ;;  %s357_s2 = inlined_call_operand.vmem [shape: f32[8,2], index: 2, kind: output, shape index: {}]  }
   0x1   :  { %v11_v0 = vld [vmem:[%s355_s0] sm:$0xff]  ;;  %v12_v1 = vld [vmem:[%s355_s0 + $0x8] sm:$0xff]  ;;  %v265_v2 = vld [vmem:[%s356_s1 + $0x38] sm:$0xff]  ;;  %275 = vset.pattern.permute.xlu0 %v282_v28 }
   0x2   :  { %v13_v3 = vmax.f32 %v11_v0, %v12_v1  ;;  %v273_v4 = vld [vmem:[%s356_s1 + $0x78] sm:$0xff]  ;;  %152 = vmatpush.bf16.msra.mxu0 %v265_v2  ;;  %v264_v5 = vld [vmem:[%s356_s1 + $0x30] sm:$0xff]  ;;  %v263_v7 = vld [vmem:[%s356_s1 + $0x28] sm:$0xff] }
   0x3   :  { %165 = vmatpush.bf16.msra.mxu1 %v273_v4  ;;  %v272_v6 = vld [vmem:[%s356_s1 + $0x70] sm:$0xff]  ;;  %v271_v8 = vld [vmem:[%s356_s1 + $0x68] sm:$0xff]  ;;  %v262_v9 = vld [vmem:[%s356_s1 + $0x20] sm:$0xff] }
   0x4   :  { %14 = vmax.xlane.f32.xlu0 %v13_v3  ;;  %v270_v10 = vld [vmem:[%s356_s1 + $0x60] sm:$0xff]  ;;  %v261_v11 = vld [vmem:[%s356_s1 + $0x18] sm:$0xff]  ;;  %v260_v13 = vld [vmem:[%s356_s1 + $0x10] sm:$0xff] }
   0x5   :  { %v269_v12 = vld [vmem:[%s356_s1 + $0x58] sm:$0xff]  ;;  %v268_v14 = vld [vmem:[%s356_s1 + $0x50] sm:$0xff]  ;;  %v259_v15 = vld [vmem:[%s356_s1 + $0x8] sm:$0xff] }
   0x6   :  { %153 = vmatpush.bf16.msra.mxu0 %v264_v5  ;;  %v267_v16 = vld [vmem:[%s356_s1 + $0x48] sm:$0xff]  ;;  %v258_v17 = vld [vmem:[%s356_s1] sm:$0xff] }
   0x7   :  { %166 = vmatpush.bf16.msra.mxu1 %v272_v6  ;;  %v266_v18 = vld [vmem:[%s356_s1 + $0x40] sm:$0xff] }
   0xa   :  { %154 = vmatpush.bf16.msra.mxu0 %v263_v7 }
   0xb   :  { %167 = vmatpush.bf16.msra.mxu1 %v271_v8 }
   0xe   :  { %155 = vmatpush.bf16.msra.mxu0 %v262_v9 }
   0xf   :  { %168 = vmatpush.bf16.msra.mxu1 %v270_v10 }
  0x12   :  { %156 = vmatpush.bf16.msra.mxu0 %v261_v11 }
  0x13   :  { %169 = vmatpush.bf16.msra.mxu1 %v269_v12 }
  0x16   :  { %157 = vmatpush.bf16.msra.mxu0 %v260_v13 }
  0x17   :  { %170 = vmatpush.bf16.msra.mxu1 %v268_v14 }
  0x1a   :  { %158 = vmatpush.bf16.msra.mxu0 %v259_v15 }
  0x1b   :  { %171 = vmatpush.bf16.msra.mxu1 %v267_v16 }
  0x1e   :  { %159 = vmatpush.bf16.msra.mxu0 %v258_v17 }
  0x1f   :  { %172 = vmatpush.bf16.msra.mxu1 %v266_v18 }
  0x77   :  { %v15_v19 = vpop.xlane.xlu0 %14 }
  0x78   :  { %v16_v20 = vsub.f32 %v11_v0, %v15_v19  ;;  %v17_v21 = vsub.f32 %v12_v1, %v15_v19 }
  0x7a   :  { %v18_v22 = vmul.f32 1.442695, %v16_v20  ;;  %v20_v23 = vmul.f32 1.442695, %v17_v21 }
  0x7c   :  { %276 = vpow2.f32 %v18_v22 }
  0x7d   :  { %278 = vpow2.f32 %v20_v23 }
  0x82   :  { %v277_v24 = vpop.eup %276 }
  0x83   :  { %v279_v25 = vpop.eup %278  ;;  %v22_v26 = vpack.c.bf16 %v277_v24, %v277_v24 }
  0x84   :  { %v23_v27 = vpack.c.bf16 %v279_v25, %v279_v25 }
  0x85   :  { %160 = vmatmul.bf16.vlgmr.msra.gmra.mxu0 %v22_v26 }
  0x86   :  { %173 = vmatmul.bf16.vlgmr.msra.gmra.mxu1 %v23_v27 }
 0x102   :  { %v161_v29 = vpop.f32.mrf.mxu0 }
 0x103   :  { %v174_v30 = vpop.f32.mrf.mxu1 }
 0x104   :  { %v175_v31 = vadd.f32 %v174_v30, %v161_v29 }
 0x106   :  { %280 = vrcp.f32 %v175_v31 }
 0x10a   :  { %v163_v32 = vpop.f32.mrf.mxu0 }
 0x10b   :  { %v176_v33 = vpop.f32.mrf.mxu1 }
 0x10c   :  { %v281_v34 = vpop.eup %280 }
 0x10d   :  { %v179_v35 = vmul.f32 %v281_v34, %v175_v31 }
 0x10f   :  { %v180_v36 = vsub.f32 2.0, %v179_v35 }
 0x111   :  { %v181_v37 = vmul.f32 %v281_v34, %v180_v36 }
 0x113   :  { %184 = vperm.xlu0 %275, %v181_v37  }
 0x185   :  { %v185_v38 = vpop.permute.xlu0 %184 }
 0x186   :  { %v187_v39 = vmul.f32 %v185_v38, %v175_v31 }
 0x188   :  { %189 = vst.msk [vmem:[%s357_s2] sm:$0xff] %vm188_vm0, %v187_v39 }

</bundles_post_ra>
